<compile_context>
chip_gen: v6e
topology: v6e:2x2x1
jax: 0.10.0
libtpu: 0.0.40
codegen_flags: <defaults>
</compile_context>

<pallas_src>
import functools
import math

import jax
import jax.numpy as jnp
from jax.experimental import pallas as pl
from jax.experimental.pallas import tpu as pltpu


def _round_up(x, m):
    return ((x + m - 1) // m) * m


def _cdiv(a, b):
    return -(-a // b)


# ---------------------------------------------------------------------------
# Kernel
# ---------------------------------------------------------------------------
def _stft_kernel(chunks_hbm, bases_ref, o_ref, *scratch, tile_m, chunk, n_taps,
                 rows_per_batch, dense, use_bf16):
    """One (b, i, j) grid step.

    chunks_hbm : (B * rows_per_batch, chunk) f32 HBM ref; row (b*rows_per_batch + r) holds
                 signal[b, r*chunk : (r+1)*chunk].  Frame m of batch b is the concatenation
                 of rows m .. m+n_taps-1 (chunk == hop on the fused path).
    bases_ref  : (K, tile_n) block of the hann-windowed DFT bases, K = n_taps * chunk.
    o_ref      : (tile_m, tile_n) lane-dense output block.
    """
    if n_taps == 1:
        frames_vmem, sem = scratch
        window_vmem = frames_vmem
    elif dense:
        frames_vmem, window_vmem, sem = scratch
    else:
        window_vmem, sem = scratch
        frames_vmem = None

    b = pl.program_id(0)
    i = pl.program_id(1)
    j = pl.program_id(2)

    # The signal window depends only on (b, i); j is the innermost grid axis, so fetch and
    # repack once per M tile and reuse the VMEM scratch across all N tiles.
    @pl.when(j == 0)
    def _fetch_and_pack():
        base_row = b * rows_per_batch + i * tile_m
        cp = pltpu.make_async_copy(
            chunks_hbm.at[pl.ds(base_row, tile_m + n_taps - 1), :],
            window_vmem,
            sem.at[0],
        )
        cp.start()
        # TODO(synk): double-buffer the window and prefetch the next M tile here; skipped
        # because a cross-tile DMA chain is not safe once the "parallel" grid axes are split
        # across TensorCores (megacore / v7x).
        cp.wait()
        if dense and n_taps > 1:
            # Repack the overlapping taps into one contiguous (tile_m, K) MXU operand so a
            # single deep-K matmul accumulates inside the MXU result buffer.
            row_blk = min(tile_m, 256)
            for r in range(n_taps):
                lane0 = r * chunk
                for m0 in range(0, tile_m, row_blk):
                    mb = min(row_blk, tile_m - m0)
                    val = window_vmem[m0 + r:m0 + r + mb, :]
                    if use_bf16:
                        val = val.astype(jnp.bfloat16)
                    frames_vmem[m0:m0 + mb, lane0:lane0 + chunk] = val

    if dense:
        lhs = frames_vmem[...]
        if use_bf16:
            lhs = lhs.astype(jnp.bfloat16)
        o_ref[...] = jnp.dot(lhs, bases_ref[...], preferred_element_type=jnp.float32)
    else:
        # hop not a multiple of 128: per-tap K=chunk matmuls from sublane-shifted views of
        # the single window DMA (still no redundant HBM reads, no lane-padded tap scratch).
        # TODO(synk): dense (tile_m, K) repack for non-128-aligned hops (needs unaligned
        # lane-slice stores / packing several taps per 128-lane group).
        acc = None
        for r in range(n_taps):
            lhs = window_vmem[r:r + tile_m, :]
            if use_bf16:
                lhs = lhs.astype(jnp.bfloat16)
            part = jnp.dot(lhs, bases_ref[r * chunk:(r + 1) * chunk, :],
                           preferred_element_type=jnp.float32)
            acc = part if acc is None else acc + part
        o_ref[...] = acc


def _vmem_budget(tile_m, K, tile_n, chunk, n_taps, dense, use_bf16):
    base_b = 2 if use_bf16 else 4
    total = 2 * _round_up(K, 8) * tile_n * base_b       # double-buffered bases block
    total += 2 * tile_m * tile_n * 4                    # double-buffered output block
    lane_chunk = _round_up(chunk, 128)
    if n_taps == 1:
        total += tile_m * lane_chunk * 4                # frames (== DMA target)
    else:
        total += (tile_m + n_taps - 1 + 8) * lane_chunk * 4   # window
        if dense:
            total += tile_m * _round_up(K, 128) * (2 if use_bf16 else 4)  # frames
        else:
            total += tile_m * tile_n * 4                # per-tap accumulator value
    return total


def _stft_matmul(chunks_flat, bases_pad, *, batch, rows_per_batch, chunk, n_taps,
                 tile_m, tile_n, num_m_tiles, dense, use_bf16, vmem_limit):
    """chunks_flat: (batch*rows_per_batch, chunk), bases_pad: (K, n_pad)
       -> (batch*num_m_tiles*tile_m, n_pad) f32."""
    K, n_pad = bases_pad.shape
    assert n_pad % tile_n == 0
    num_n_tiles = n_pad // tile_n
    m_pad = num_m_tiles * tile_m

    kernel = functools.partial(
        _stft_kernel, tile_m=tile_m, chunk=chunk, n_taps=n_taps,
        rows_per_batch=rows_per_batch, dense=dense, use_bf16=use_bf16)

    frames_dtype = jnp.bfloat16 if use_bf16 else jnp.float32
    if n_taps == 1:
        scratch = [pltpu.VMEM((tile_m, chunk), jnp.float32),
                   pltpu.SemaphoreType.DMA((1,))]
    elif dense:
        scratch = [pltpu.VMEM((tile_m, K), frames_dtype),
                   pltpu.VMEM((tile_m + n_taps - 1, chunk), jnp.float32),
                   pltpu.SemaphoreType.DMA((1,))]
    else:
        scratch = [pltpu.VMEM((tile_m + n_taps - 1, chunk), jnp.float32),
                   pltpu.SemaphoreType.DMA((1,))]

    return pl.pallas_call(
        kernel,
        out_shape=jax.ShapeDtypeStruct((batch * m_pad, n_pad), jnp.float32),
        grid_spec=pltpu.PrefetchScalarGridSpec(
            num_scalar_prefetch=0,
            grid=(batch, num_m_tiles, num_n_tiles),
            in_specs=[
                pl.BlockSpec(memory_space=pl.ANY),                  # signal chunks in HBM
                pl.BlockSpec((K, tile_n), lambda b, i, j: (0, j)),  # DFT bases (resident)
            ],
            out_specs=pl.BlockSpec(
                (tile_m, tile_n), lambda b, i, j: (b * num_m_tiles + i, j)),
            scratch_shapes=scratch,
        ),
        compiler_params=pltpu.CompilerParams(
            dimension_semantics=("parallel", "parallel", "arbitrary"),
            vmem_limit_bytes=int(vmem_limit),
        ),
    )(chunks_flat, bases_pad)


@functools.partial(jax.jit, static_argnames=(
    "n_fft", "hop", "center", "pad_mode", "cutoff", "n_cols", "chunk", "n_taps",
    "fused", "dense", "use_bf16", "tile_m_default", "tile_n", "vmem_limit_cap"))
def _stft_forward(x, bases_pad, *, n_fft, hop, center, pad_mode, cutoff, n_cols,
                  chunk, n_taps, fused, dense, use_bf16, tile_m_default, tile_n,
                  vmem_limit_cap):
    """x: (B, L) f32 -> (B, cutoff, n_frames, 2) f32 (torch real-view layout)."""
    B, L = x.shape
    if center:
        pad = n_fft // 2
        if pad_mode == "reflect":
            assert L > pad, "reflect padding requires input length > n_fft // 2"
        x = jnp.pad(x, ((0, 0), (pad, pad)), mode=pad_mode)
    L_pad = x.shape[-1]
    assert L_pad >= n_fft, f"n_fft={n_fft} too large for (padded) length {L_pad}"
    n_frames = 1 + (L_pad - n_fft) // hop

    K, n_pad = bases_pad.shape

    # --- M tiling (all static at trace time). tile_m kept a multiple of 16. ---
    tile_m = _round_up(int(min(tile_m_default, _round_up(n_frames, 16))), 16)
    num_m_tiles = _cdiv(n_frames, tile_m)
    # Keep at least 2 "parallel" grid blocks so both v7x TensorCores have work.
    if B * num_m_tiles < 2 and n_frames > 64:
        tile_m = _round_up(_cdiv(n_frames, 2), 16)
        num_m_tiles = _cdiv(n_frames, tile_m)
    # Shrink tile_m until the per-step VMEM footprint fits under the limit.
    while tile_m > 16 and (_vmem_budget(tile_m, K, tile_n, chunk, n_taps, dense, use_bf16)
                           + (8 << 20)) > vmem_limit_cap:
        tile_m = max(16, _round_up(tile_m // 2, 16))
        num_m_tiles = _cdiv(n_frames, tile_m)
    m_pad = num_m_tiles * tile_m

    # --- framing prep ---
    if fused:
        # Signal stays as raw (rows, hop) chunks; framing happens inside the kernel.
        rows = m_pad + n_taps - 1
        target_len = rows * chunk
        if L_pad < target_len:
            x = jnp.pad(x, ((0, 0), (0, target_len - L_pad)))
        else:
            x = x[:, :target_len]
        chunks_flat = x.reshape(B * rows, chunk)
    else:
        # hop not 8-aligned: fall back to an XLA gather that materializes the overlapping
        # frames in HBM before the kernel.
        rows = m_pad
        idx = jnp.arange(n_frames)[:, None] * hop + jnp.arange(n_fft)[None, :]
        frames = x[:, idx]                                       # (B, n_frames, n_fft)
        frames = jnp.pad(frames, ((0, 0), (0, m_pad - n_frames), (0, 0)))
        chunks_flat = frames.reshape(B * rows, chunk)

    vmem_limit = int(min(max(
        _vmem_budget(tile_m, K, tile_n, chunk, n_taps, dense, use_bf16) + (8 << 20),
        32 << 20), vmem_limit_cap))

    out = _stft_matmul(chunks_flat, bases_pad, batch=B, rows_per_batch=rows,
                       chunk=chunk, n_taps=n_taps, tile_m=tile_m, tile_n=tile_n,
                       num_m_tiles=num_m_tiles, dense=dense, use_bf16=use_bf16,
                       vmem_limit=vmem_limit)                    # (B*m_pad, n_pad)

    out = out.reshape(B, m_pad, n_pad)[:, :n_frames, :n_cols]
    out = out.reshape(B, n_frames, cutoff, 2)                    # (B, T, F, 2)
    # TODO(synk): this transpose is an extra HBM pass; skip it if the consumer accepts
    # (B, T, F, 2) directly (the module's contract is (B, F, T, 2)).
    out = jnp.transpose(out, (0, 2, 1, 3))                       # (B, F, T, 2)
    return out


class ShortTimeFourierTransformPallas:
    """JAX/Pallas port of the PyTorch ShortTimeFourierTransform forward pass
    (the fft / matmul / conv impls of the reference all produce the same result)."""

    def __init__(self, n_fft=512, hop_length=128, win_length=None, window="hann",
                 center=True, pad_mode="reflect", normalized=False, onesided=True,
                 tile_m=512, use_bf16=False):
        self.n_fft = n_fft
        if win_length is None:
            win_length = n_fft
        self.win_length = win_length
        if hop_length is None:
            hop_length = int(win_length // 4)
        self.hop_length = hop_length
        self.center = center
        self.pad_mode = pad_mode
        self.normalized = normalized
        self.onesided = onesided
        self.cutoff = n_fft // 2 + 1 if onesided else n_fft
        self.tile_m_default = int(tile_m)
        self.use_bf16 = bool(use_bf16)

        # Framing plan: on the fused path frame m = chunks m..m+n_taps-1 of width hop, with
        # K = n_taps*hop and the bases zero-padded along K past n_fft (covers hop | n_fft
        # and hop not dividing n_fft alike).  Non-8-aligned hops use the gather fallback.
        self.fused = (hop_length % 8 == 0)
        if self.fused:
            self.chunk = hop_length
            self.n_taps = _cdiv(n_fft, hop_length)
        else:
            self.chunk = n_fft
            self.n_taps = 1
        self.K = self.n_taps * self.chunk
        # Dense path: one contiguous (tile_m, K) MXU operand (single deep-K matmul).
        self.dense = (self.n_taps == 1) or (self.chunk % 128 == 0)

        # Generation-aware VMEM caps: resident bases block <= ~6 MiB / limit 56 MiB on
        # 64-MiB-VMEM parts (v7x), <= ~16 MiB / limit 100 MiB on 128-MiB parts (v5e/v6e).
        try:
            vmem_cap = int(getattr(pltpu.get_tpu_info(), "vmem_capacity_bytes", 64 << 20))
        except Exception:
            vmem_cap = 64 << 20
        if vmem_cap >= (100 << 20):
            bases_cap = 16 << 20
            self.vmem_limit_cap = 100 << 20
        else:
            bases_cap = 6 << 20
            self.vmem_limit_cap = 56 << 20

        # DFT bases (torch.fft.rfft convention X[f] = sum_n x[n] * exp(-2*pi*i*n*f/N)).
        # Integer (n*f mod N) angle reduction keeps f32 cos/sin accurate for large n_fft.
        n = jnp.arange(n_fft, dtype=jnp.int32)
        f = jnp.arange(self.cutoff, dtype=jnp.int32)
        phase = (n[:, None] * f[None, :]) % n_fft
        ang = (2.0 * math.pi / n_fft) * phase.astype(jnp.float32)
        dft = jnp.stack([jnp.cos(ang), -jnp.sin(ang)], axis=-1)      # (n_fft, cutoff, 2)

        # Periodic hann window (torch.hann_window(win_length, periodic=True)), center-padded
        # to n_fft; normalized_scale matches the reference module exactly.
        if window == "hann":
            k = jnp.arange(win_length, dtype=jnp.float32)
            w = 0.5 * (1.0 - jnp.cos(2.0 * math.pi * k / win_length))
            self.normalized_scale = float(jnp.sqrt(jnp.sum(w * w)))
        elif window is None:
            w = jnp.ones((win_length,), dtype=jnp.float32)
            self.normalized_scale = math.sqrt(n_fft)
        else:
            # TODO(synk): callable / list / tensor windows of the reference are not ported.
            raise ValueError(f"window {window!r} not supported in this port")
        lpad = (n_fft - win_length) // 2
        w = jnp.pad(w, (lpad, n_fft - win_length - lpad))

        # Fold window (and optional normalization) into the matmul bases; zero-pad K rows.
        self.n_cols = 2 * self.cutoff
        bases2d = (w[:, None, None] * dft).reshape(n_fft, self.n_cols)
        if normalized:
            bases2d = bases2d / self.normalized_scale
        bases2d = jnp.pad(bases2d, ((0, self.K - n_fft), (0, 0)))    # (K, n_cols)

        # Lane-dense output: pad columns to a multiple of 128 (and of the N tile).
        bases_dtype = jnp.bfloat16 if self.use_bf16 else jnp.float32
        bytes_per = 2 if self.use_bf16 else 4
        n_pad0 = _round_up(self.n_cols, 128)
        tile_n_cap = max(128, ((bases_cap // (self.K * bytes_per)) // 128) * 128)
        self.tile_n = int(min(n_pad0, tile_n_cap))
        self.n_pad = _round_up(self.n_cols, self.tile_n)
        self.bases_pad = jnp.pad(
            bases2d, ((0, 0), (0, self.n_pad - self.n_cols))).astype(bases_dtype)

    def __call__(self, x):
        assert x.ndim in (1, 2), x.ndim
        has_batch = x.ndim == 2
        if not has_batch:
            x = x[None, :]
        x = x.astype(jnp.float32)
        out = _stft_forward(
            x, self.bases_pad,
            n_fft=self.n_fft, hop=self.hop_length, center=self.center,
            pad_mode=self.pad_mode, cutoff=self.cutoff, n_cols=self.n_cols,
            chunk=self.chunk, n_taps=self.n_taps, fused=self.fused, dense=self.dense,
            use_bf16=self.use_bf16, tile_m_default=self.tile_m_default,
            tile_n=self.tile_n, vmem_limit_cap=self.vmem_limit_cap)
        if not has_batch:
            out = out[0]
        return out


if __name__ == "__main__":
    key = jax.random.PRNGKey(0)

    def reference(x, n_fft, hop):
        pad = n_fft // 2
        xp = jnp.pad(x, ((0, 0), (pad, pad)), mode="reflect")
        n_frames = 1 + (xp.shape[-1] - n_fft) // hop
        idx = jnp.arange(n_frames)[:, None] * hop + jnp.arange(n_fft)[None, :]
        k = jnp.arange(n_fft, dtype=jnp.float32)
        w = 0.5 * (1.0 - jnp.cos(2.0 * jnp.pi * k / n_fft))
        frames = xp[:, idx] * w[None, None, :]
        c = jnp.fft.rfft(frames, axis=-1)                        # (B, T, F)
        ref = jnp.stack([c.real, c.imag], axis=-1)               # (B, T, F, 2)
        return jnp.transpose(ref, (0, 2, 1, 3))                  # (B, F, T, 2)

    def check(stft, x, n_fft, hop, atol, rtol):
        out = jax.block_until_ready(stft(x))
        ref = reference(x, n_fft, hop)
        assert out.shape == ref.shape, (out.shape, ref.shape)
        err = float(jnp.max(jnp.abs(out - ref)))
        assert jnp.allclose(out, ref, atol=atol, rtol=rtol), err

    x_small = jax.random.normal(key, (2, 512), dtype=jnp.float32)
    x_med = jax.random.normal(jax.random.PRNGKey(1), (2, 1024), dtype=jnp.float32)
    x_long = jax.random.normal(jax.random.PRNGKey(2), (1, 16384), dtype=jnp.float32)

    # Default config (n_fft=512, hop=128): fused framing + dense single deep-K matmul.
    check(ShortTimeFourierTransformPallas(n_fft=512, hop_length=128), x_med, 512, 128,
          atol=5e-3, rtol=5e-3)
    # Long single-batch signal: multiple M tiles + the >=2 parallel-blocks split.
    check(ShortTimeFourierTransformPallas(n_fft=512, hop_length=128), x_long, 512, 128,
          atol=5e-3, rtol=5e-3)
    # Small hop (32): fused, per-tap (non-128-aligned) path, single window DMA.
    check(ShortTimeFourierTransformPallas(n_fft=128, hop_length=32), x_small, 128, 32,
          atol=2e-3, rtol=2e-3)
    # hop that does not divide n_fft (48): fused path with zero-padded K.
    check(ShortTimeFourierTransformPallas(n_fft=128, hop_length=48), x_small, 128, 48,
          atol=2e-3, rtol=2e-3)
    # hop not 8-aligned (20): XLA-gather fallback path.
    check(ShortTimeFourierTransformPallas(n_fft=128, hop_length=20), x_small, 128, 20,
          atol=2e-3, rtol=2e-3)
    # Optional bf16 MXU inputs: smoke test with a loose tolerance.
    check(ShortTimeFourierTransformPallas(n_fft=512, hop_length=128, use_bf16=True),
          x_med, 512, 128, atol=0.5, rtol=0.05)

    print("KERNEL_OK")
</pallas_src>

<mosaic_0001>
module attributes {stable_mosaic.version = 11 : i64} {
  func.func @_stft_kernel(%arg0: i32, %arg1: i32, %arg2: i32, %arg3: memref<38x128xf32, #tpu.memory_space<any>>, %arg4: memref<512x640xf32, #tpu.memory_space<vmem>>, %arg5: memref<16x640xf32, #tpu.memory_space<vmem>>, %arg6: memref<16x512xf32, #tpu.memory_space<vmem>>, %arg7: memref<19x128xf32, #tpu.memory_space<vmem>>, %arg8: memref<1x!tpu.dma_semaphore, #tpu.memory_space<semaphore_mem>>) attributes {dimension_semantics = [#tpu.dimension_semantics<parallel>, #tpu.dimension_semantics<parallel>, #tpu.dimension_semantics<arbitrary>], iteration_bounds = array<i64: 2, 1, 1>, scalar_prefetch = 0 : i64, scratch_operands = 3 : i64, tpu.core_type = #tpu.core_type<tc>, window_params = [{}, {transform_indices = @transform_1, window_bounds = array<i64: 512, 640>}, {transform_indices = @transform_2, window_bounds = array<i64: 16, 640>}]} {
    %c0_i32 = arith.constant 0 : i32
    %0 = arith.cmpi eq, %arg2, %c0_i32 : i32
    %1 = arith.extui %0 : i1 to i32
    %c0_i32_0 = arith.constant 0 : i32
    %2 = arith.cmpi ne, %1, %c0_i32_0 : i32
    scf.if %2 {
      %c19_i32 = arith.constant 19 : i32
      %7 = arith.muli %arg0, %c19_i32 : i32
      %c16_i32 = arith.constant 16 : i32
      %8 = arith.muli %arg1, %c16_i32 : i32
      %9 = arith.addi %7, %8 : i32
      %c0_i32_6 = arith.constant 0 : i32
      %c0_i32_7 = arith.constant 0 : i32
      %10 = tpu.memref_slice %arg3[%9, %c0_i32_7] : memref<38x128xf32, #tpu.memory_space<any>> -> memref<19x128xf32, #tpu.memory_space<any>>
      %11 = tpu.memref_slice %arg8[%c0_i32_6] : memref<1x!tpu.dma_semaphore, #tpu.memory_space<semaphore_mem>> -> memref<1x!tpu.dma_semaphore, #tpu.memory_space<semaphore_mem>>
      %12 = tpu.memref_squeeze %11 : memref<1x!tpu.dma_semaphore, #tpu.memory_space<semaphore_mem>> -> memref<!tpu.dma_semaphore, #tpu.memory_space<semaphore_mem>>
      tpu.enqueue_dma source(%10 : memref<19x128xf32, #tpu.memory_space<any>>) target(%arg7 : memref<19x128xf32, #tpu.memory_space<vmem>>) target_semaphore(%12 : memref<!tpu.dma_semaphore, #tpu.memory_space<semaphore_mem>>)
      %c0_i32_8 = arith.constant 0 : i32
      %c0_i32_9 = arith.constant 0 : i32
      %13 = tpu.memref_slice %arg3[%9, %c0_i32_9] : memref<38x128xf32, #tpu.memory_space<any>> -> memref<19x128xf32, #tpu.memory_space<any>>
      %14 = tpu.memref_slice %arg8[%c0_i32_8] : memref<1x!tpu.dma_semaphore, #tpu.memory_space<semaphore_mem>> -> memref<1x!tpu.dma_semaphore, #tpu.memory_space<semaphore_mem>>
      %15 = tpu.memref_squeeze %14 : memref<1x!tpu.dma_semaphore, #tpu.memory_space<semaphore_mem>> -> memref<!tpu.dma_semaphore, #tpu.memory_space<semaphore_mem>>
      tpu.wait_dma2 semaphore(%15 : memref<!tpu.dma_semaphore, #tpu.memory_space<semaphore_mem>>) src(%13 : memref<19x128xf32, #tpu.memory_space<any>>) dst(%arg7 : memref<19x128xf32, #tpu.memory_space<vmem>>)
      %c0_10 = arith.constant 0 : index
      %c0_11 = arith.constant 0 : index
      %16 = vector.load %arg7[%c0_10, %c0_11] : memref<19x128xf32, #tpu.memory_space<vmem>>, vector<16x128xf32>
      %c0_12 = arith.constant 0 : index
      %c0_13 = arith.constant 0 : index
      %17 = vector.load %arg6[%c0_12, %c0_13] : memref<16x512xf32, #tpu.memory_space<vmem>>, vector<16x128xf32>
      tpu.vector_store %arg6[%c0_12, %c0_13], %16 {strides = array<i32>} : memref<16x512xf32, #tpu.memory_space<vmem>>, vector<16x128xf32>,
      %c1 = arith.constant 1 : index
      %c0_14 = arith.constant 0 : index
      %18 = vector.load %arg7[%c1, %c0_14] : memref<19x128xf32, #tpu.memory_space<vmem>>, vector<16x128xf32>
      %c0_15 = arith.constant 0 : index
      %c128 = arith.constant 128 : index
      %19 = vector.load %arg6[%c0_15, %c128] : memref<16x512xf32, #tpu.memory_space<vmem>>, vector<16x128xf32>
      tpu.vector_store %arg6[%c0_15, %c128], %18 {strides = array<i32>} : memref<16x512xf32, #tpu.memory_space<vmem>>, vector<16x128xf32>,
      %c2 = arith.constant 2 : index
      %c0_16 = arith.constant 0 : index
      %20 = vector.load %arg7[%c2, %c0_16] : memref<19x128xf32, #tpu.memory_space<vmem>>, vector<16x128xf32>
      %c0_17 = arith.constant 0 : index
      %c256 = arith.constant 256 : index
      %21 = vector.load %arg6[%c0_17, %c256] : memref<16x512xf32, #tpu.memory_space<vmem>>, vector<16x128xf32>
      tpu.vector_store %arg6[%c0_17, %c256], %20 {strides = array<i32>} : memref<16x512xf32, #tpu.memory_space<vmem>>, vector<16x128xf32>,
      %c3 = arith.constant 3 : index
      %c0_18 = arith.constant 0 : index
      %22 = vector.load %arg7[%c3, %c0_18] : memref<19x128xf32, #tpu.memory_space<vmem>>, vector<16x128xf32>
      %c0_19 = arith.constant 0 : index
      %c384 = arith.constant 384 : index
      %23 = vector.load %arg6[%c0_19, %c384] : memref<16x512xf32, #tpu.memory_space<vmem>>, vector<16x128xf32>
      tpu.vector_store %arg6[%c0_19, %c384], %22 {strides = array<i32>} : memref<16x512xf32, #tpu.memory_space<vmem>>, vector<16x128xf32>,
    } else {
    }
    %c0 = arith.constant 0 : index
    %c0_1 = arith.constant 0 : index
    %3 = vector.load %arg6[%c0, %c0_1] : memref<16x512xf32, #tpu.memory_space<vmem>>, vector<16x512xf32>
    %c0_2 = arith.constant 0 : index
    %c0_3 = arith.constant 0 : index
    %4 = vector.load %arg4[%c0_2, %c0_3] : memref<512x640xf32, #tpu.memory_space<vmem>>, vector<512x640xf32>
    %cst = arith.constant dense<0.000000e+00> : vector<16x640xf32>
    %5 = tpu.matmul %3, %4, %cst {dimension_numbers = #tpu.dot_dimension_numbers<[1], [0], [0], [1], [0, 0, 1, 1], [], []>} : vector<16x512xf32>, vector<512x640xf32>, vector<16x640xf32> -> vector<16x640xf32>
    %c0_4 = arith.constant 0 : index
    %c0_5 = arith.constant 0 : index
    %6 = vector.load %arg5[%c0_4, %c0_5] : memref<16x640xf32, #tpu.memory_space<vmem>>, vector<16x640xf32>
    tpu.vector_store %arg5[%c0_4, %c0_5], %5 {strides = array<i32>} : memref<16x640xf32, #tpu.memory_space<vmem>>, vector<16x640xf32>,
    return
  }
  func.func @transform_1(%arg0: i32, %arg1: i32, %arg2: i32) -> (i32, i32) {
    %c0_i32 = arith.constant 0 : i32
    %c0_i32_0 = arith.constant 0 : i32
    return %c0_i32, %arg2 : i32, i32
  }
  func.func @transform_2(%arg0: i32, %arg1: i32, %arg2: i32) -> (i32, i32) {
    %c1_i32 = arith.constant 1 : i32
    %0 = arith.muli %arg0, %c1_i32 : i32
    %1 = arith.addi %0, %arg1 : i32
    %c0_i32 = arith.constant 0 : i32
    return %1, %arg2 : i32, i32
  }
}

</mosaic_0001>

<bundles_post_ra>
// kernel: _stft_forward.1
= control target key start
LH: loop header
LB: loop body
LE: loop exit
PB: predicated region body
PF: predicated region fallthrough
CT: control target
= control target key end

     0   :  { %7 = vsyncpa [#allocation6], 0  ;;  %s1357_s9 = smov 0   ;;  %s1359_s10 = smov 0   ;;  %s1468_s0 = inlined_call_operand.vmem [shape: f32[38,128], index: 0, kind: input, shape index: {}]   ;;  %s1469_s1 = inlined_call_operand.hbm [shape: f32[512,640], index: 1, kind: input, shape index: {}]   ;;  %s1470_s2 = inlined_call_operand.vmem [shape: f32[32,640], index: 2, kind: output, shape index: {}]  }
   0x1   :  { %s1361_s11 = smov 0  }
   0x2 LB: > { %s1157_s12 = sadd.s32 4294967295, %s1337_s11   ;;  %s32_s13 = sadd.s32 1, %s1333_s10  ;;  %s1337_s11 = sphi %s1361_s11, %s13_s11   ;;  %s1333_s10 = sphi %s1359_s10, %s1474_s10   ;;  %s1329_s9 = sphi %s1357_s9, %s1473_s9  }
   0x3   : > { %p34_p0 = scmp.ge.s32.totalorder %s32_s13, 2  ;;  %p1159_p1 = scmp.ge.s32.totalorder %s1337_s11, 1 }
   0x4   : > { %p93_p2 = scmp.lt.s32.totalorder %s1337_s11, 3  ;;  %p1382_p4 = scmp.eq.s32.totalorder %s1157_s12, 0 }
   0x5   : > { %s1476_s13 = smov (%p34_p0, %s32_s13), 0  ;;  %s1339_s16 = smov [#allocation5]  }
   0x6   : > { %p1378_p3 = pnand %p1159_p1, %p93_p2  ;;  %s108_s17 = sshll.u32 %s1339_s16, 4  ;;  %s109_s17 = int_to_ptr.vmem [resolvable:$true] %s108_s17 }
   0x7   : > { %s1294_s18 = scalar_lea.vmem %s109_s17, 40960  ;;  %p1302_p11 = scmp.lt.s32.totalorder %s109_s17, %s109_s17 }
   0x8   : > { %p1250_p5 = pneg %p1378_p3  ;;  %p1295_p8 = scmp.ne.s32.totalorder %s109_s17, %s1294_s18 }
   0x9   : > { %p1303_p12 = scmp.lt.s32.totalorder %s1294_s18, %s1294_s18 }
   0xa   : > { %p1251_p6 = pnand %p1382_p4, %p1250_p5 }
   0xb   : > { %p1304_p13 = por %p1303_p12, %p1302_p11 }
   0xc   : > { %p1285_p7 = pneg %p1251_p6 }
   0xe   : > { %p1297_p9 = pnand %p1295_p8, %p1285_p7 }
  0x10   : > { %p1298_p10 = pneg %p1297_p9 }
  0x12   : > { %p1305_p0 = pnand %p1304_p13, %p1298_p10 }
  0x14   : > { %1308 = shalt.err (!%p1305_p0)
}
  0x15   : > { %s1340_s19 = smov 640   ;;  %s1341_s20 = smov 40  }
  0x16   : > { %1253 = dma.hbm_to_vmem [thread:$0]  (!%p1251_p6), %s1469_s1, 40960, %s109_s17, [#allocation6], %s1340_s19, %s1340_s19, %s1341_s20  }
  0x17   : > { %124 = sbr.rel (%p1378_p3) target bundleno = 413 (0x19d), region = 24 }
  0x1c   : > { %1322 = dma.done.wait (%p1382_p4), [#allocation6], 40960  }
  0x1d   : > { %1324 = vsyncadd (%p1382_p4), [#allocation6], 4294926336  ;;  %s1163_s23 = sshll.u32 %s1329_s9, 1  ;;  %s164_s24 = smul.u32 19, %s1329_s9 }
  0x1e   : > { %p149_p1 = scmp.lt.s32.totalorder %s1163_s23, 3 }
  0x1f   : > { %s167_s27 = scalar_lea.vmem %s1468_s0, %s164_s24 }
  0x20   : > { %s1478_s23 = smov (!%p149_p1, %s1163_s23), 3  ;;  %v206_v0 = vld [vmem:[%s167_s27] sm:$0xff]  ;;  %v208_v1 = vld [vmem:[%s167_s27 + $0x8] sm:$0xff]  ;;  %v1165_v2 = vld [vmem:[%s167_s27 + $0x10] sm:$0x7] }
  0x21   : > { %s1245_s28 = smul.u32 40, %s1478_s23  ;;  %207 = vst [vmem:[#allocation3] sm:$0xff] %v206_v0  ;;  %209 = vst [vmem:[#allocation3 + $0x8] sm:$0xff] %v208_v1 }
  0x22   : > { %221 = vst [vmem:[#allocation3 + $0x10] sm:$0x7] %v1165_v2 }
  0x23   : > { %s1407_s3 = scalar_lea.vmem %s1470_s2, %s1245_s28 }
  0x24   : > { %225 = vsyncadd [#allocation4], 304 }
  0x25   : > { %1325 = dma.done.wait [#allocation4], 304 }
  0x26   : > { %1326 = vsyncadd [#allocation4], 4294966992  ;;  %v329_v3 = vld [vmem:[#allocation5 + $0x260] sm:$0xff]  ;;  %v328_v5 = vld [vmem:[#allocation5 + $0x258] sm:$0xff] }
  0x27   : > { %v489_v4 = vld [vmem:[#allocation5 + $0x760] sm:$0xff]  ;;  %573 = vmatprep.subr.mxu0 %v329_v3  ;;  %v488_v6 = vld [vmem:[#allocation5 + $0x758] sm:$0xff]  ;;  %v323_v9 = vld [vmem:[#allocation5 + $0x230] sm:$0xff] }
  0x28   : > { %650 = vmatprep.subr.mxu1 %v489_v4  ;;  %v324_v7 = vld [vmem:[#allocation5 + $0x238] sm:$0xff]  ;;  %574 = vmatpush1.msra.mxu0 %v328_v5  ;;  %v483_v10 = vld [vmem:[#allocation5 + $0x730] sm:$0xff]  ;;  %v318_v13 = vld [vmem:[#allocation5 + $0x208] sm:$0xff] }
  0x29   : > { %v484_v8 = vld [vmem:[#allocation5 + $0x738] sm:$0xff]  ;;  %651 = vmatpush1.msra.mxu1 %v488_v6  ;;  %v319_v11 = vld [vmem:[#allocation5 + $0x210] sm:$0xff]  ;;  %575 = vmatprep.subr.mxu0 %v324_v7  ;;  %v478_v14 = vld [vmem:[#allocation5 + $0x708] sm:$0xff] }
  0x2a   : > { %652 = vmatprep.subr.mxu1 %v484_v8  ;;  %v479_v12 = vld [vmem:[#allocation5 + $0x710] sm:$0xff]  ;;  %576 = vmatpush1.msra.mxu0 %v323_v9  ;;  %v314_v15 = vld [vmem:[#allocation5 + $0x1e8] sm:$0xff]  ;;  %v313_v17 = vld [vmem:[#allocation5 + $0x1e0] sm:$0xff] }
  0x2b   : > { %653 = vmatpush1.msra.mxu1 %v483_v10  ;;  %v474_v16 = vld [vmem:[#allocation5 + $0x6e8] sm:$0xff]  ;;  %577 = vmatprep.subr.mxu0 %v319_v11  ;;  %v473_v18 = vld [vmem:[#allocation5 + $0x6e0] sm:$0xff]  ;;  %v308_v21 = vld [vmem:[#allocation5 + $0x1b8] sm:$0xff] }
  0x2c   : > { %654 = vmatprep.subr.mxu1 %v479_v12  ;;  %578 = vmatpush1.msra.mxu0 %v318_v13  ;;  %v309_v19 = vld [vmem:[#allocation5 + $0x1c0] sm:$0xff]  ;;  %v468_v22 = vld [vmem:[#allocation5 + $0x6b8] sm:$0xff]  ;;  %v303_v25 = vld [vmem:[#allocation5 + $0x190] sm:$0xff] }
  0x2d   : > { %655 = vmatpush1.msra.mxu1 %v478_v14  ;;  %v469_v20 = vld [vmem:[#allocation5 + $0x6c0] sm:$0xff]  ;;  %579 = vmatprep.subr.mxu0 %v314_v15  ;;  %v304_v23 = vld [vmem:[#allocation5 + $0x198] sm:$0xff]  ;;  %v463_v26 = vld [vmem:[#allocation5 + $0x690] sm:$0xff] }
  0x2e   : > { %656 = vmatprep.subr.mxu1 %v474_v16  ;;  %580 = vmatpush1.msra.mxu0 %v313_v17  ;;  %v464_v24 = vld [vmem:[#allocation5 + $0x698] sm:$0xff]  ;;  %v299_v27 = vld [vmem:[#allocation5 + $0x170] sm:$0xff]  ;;  %v298_v29 = vld [vmem:[#allocation5 + $0x168] sm:$0xff] }
  0x2f   : > { %657 = vmatpush1.msra.mxu1 %v473_v18  ;;  %581 = vmatprep.subr.mxu0 %v309_v19  ;;  %v459_v28 = vld [vmem:[#allocation5 + $0x670] sm:$0xff]  ;;  %v458_v30 = vld [vmem:[#allocation5 + $0x668] sm:$0xff]  ;;  %v293_v33 = vld [vmem:[#allocation5 + $0x140] sm:$0xff] }
  0x30   : > { %658 = vmatprep.subr.mxu1 %v469_v20  ;;  %582 = vmatpush1.msra.mxu0 %v308_v21  ;;  %v294_v31 = vld [vmem:[#allocation5 + $0x148] sm:$0xff]  ;;  %v453_v34 = vld [vmem:[#allocation5 + $0x640] sm:$0xff]  ;;  %v288_v37 = vld [vmem:[#allocation5 + $0x118] sm:$0xff] }
  0x31   : > { %659 = vmatpush1.msra.mxu1 %v468_v22  ;;  %583 = vmatprep.subr.mxu0 %v304_v23  ;;  %v454_v32 = vld [vmem:[#allocation5 + $0x648] sm:$0xff]  ;;  %v289_v35 = vld [vmem:[#allocation5 + $0x120] sm:$0xff]  ;;  %v448_v38 = vld [vmem:[#allocation5 + $0x618] sm:$0xff] }
  0x32   : > { %660 = vmatprep.subr.mxu1 %v464_v24  ;;  %584 = vmatpush1.msra.mxu0 %v303_v25  ;;  %v449_v36 = vld [vmem:[#allocation5 + $0x620] sm:$0xff]  ;;  %v284_v39 = vld [vmem:[#allocation5 + $0xf8] sm:$0xff]  ;;  %v283_v41 = vld [vmem:[#allocation5 + $0xf0] sm:$0xff] }
  0x33   : > { %661 = vmatpush1.msra.mxu1 %v463_v26  ;;  %585 = vmatprep.subr.mxu0 %v299_v27  ;;  %v444_v40 = vld [vmem:[#allocation5 + $0x5f8] sm:$0xff]  ;;  %v443_v42 = vld [vmem:[#allocation5 + $0x5f0] sm:$0xff]  ;;  %v278_v45 = vld [vmem:[#allocation5 + $0xc8] sm:$0xff] }
  0x34   : > { %662 = vmatprep.subr.mxu1 %v459_v28  ;;  %586 = vmatpush1.msra.mxu0 %v298_v29  ;;  %v279_v43 = vld [vmem:[#allocation5 + $0xd0] sm:$0xff]  ;;  %v438_v46 = vld [vmem:[#allocation5 + $0x5c8] sm:$0xff]  ;;  %v273_v49 = vld [vmem:[#allocation5 + $0xa0] sm:$0xff] }
  0x35   : > { %663 = vmatpush1.msra.mxu1 %v458_v30  ;;  %587 = vmatprep.subr.mxu0 %v294_v31  ;;  %v439_v44 = vld [vmem:[#allocation5 + $0x5d0] sm:$0xff]  ;;  %v274_v47 = vld [vmem:[#allocation5 + $0xa8] sm:$0xff]  ;;  %v433_v50 = vld [vmem:[#allocation5 + $0x5a0] sm:$0xff] }
  0x36   : > { %664 = vmatprep.subr.mxu1 %v454_v32  ;;  %588 = vmatpush1.msra.mxu0 %v293_v33  ;;  %v434_v48 = vld [vmem:[#allocation5 + $0x5a8] sm:$0xff]  ;;  %v269_v51 = vld [vmem:[#allocation5 + $0x80] sm:$0xff]  ;;  %v268_v53 = vld [vmem:[#allocation5 + $0x78] sm:$0xff] }
  0x37   : > { %665 = vmatpush1.msra.mxu1 %v453_v34  ;;  %589 = vmatprep.subr.mxu0 %v289_v35  ;;  %v429_v52 = vld [vmem:[#allocation5 + $0x580] sm:$0xff]  ;;  %v428_v54 = vld [vmem:[#allocation5 + $0x578] sm:$0xff]  ;;  %v263_v57 = vld [vmem:[#allocation5 + $0x50] sm:$0xff] }
  0x38   : > { %666 = vmatprep.subr.mxu1 %v449_v36  ;;  %590 = vmatpush1.msra.mxu0 %v288_v37  ;;  %v264_v55 = vld [vmem:[#allocation5 + $0x58] sm:$0xff]  ;;  %v423_v58 = vld [vmem:[#allocation5 + $0x550] sm:$0xff]  ;;  %v258_v61 = vld [vmem:[#allocation5 + $0x28] sm:$0xff] }
  0x39   : > { %667 = vmatpush1.msra.mxu1 %v448_v38  ;;  %591 = vmatprep.subr.mxu0 %v284_v39  ;;  %v424_v56 = vld [vmem:[#allocation5 + $0x558] sm:$0xff]  ;;  %v259_v59 = vld [vmem:[#allocation5 + $0x30] sm:$0xff]  ;;  %v418_v62 = vld [vmem:[#allocation5 + $0x528] sm:$0xff] }
  0x3a   : > { %668 = vmatprep.subr.mxu1 %v444_v40  ;;  %592 = vmatpush1.msra.mxu0 %v283_v41  ;;  %v419_v60 = vld [vmem:[#allocation5 + $0x530] sm:$0xff]  ;;  %v254_v63 = vld [vmem:[#allocation5 + $0x8] sm:$0xff]  ;;  %v253_v1 = vld [vmem:[#allocation5] sm:$0xff] }
  0x3b   : > { %669 = vmatpush1.msra.mxu1 %v443_v42  ;;  %593 = vmatprep.subr.mxu0 %v279_v43  ;;  %v414_v0 = vld [vmem:[#allocation5 + $0x508] sm:$0xff]  ;;  %v413_v2 = vld [vmem:[#allocation5 + $0x500] sm:$0xff]  ;;  %v408_v5 = vld [vmem:[#allocation5 + $0x4d8] sm:$0xff] }
  0x3c   : > { %670 = vmatprep.subr.mxu1 %v439_v44  ;;  %594 = vmatpush1.msra.mxu0 %v278_v45  ;;  %v409_v3 = vld [vmem:[#allocation5 + $0x4e0] sm:$0xff]  ;;  %v568_v6 = vld [vmem:[#allocation5 + $0x9d8] sm:$0xff]  ;;  %v403_v9 = vld [vmem:[#allocation5 + $0x4b0] sm:$0xff] }
  0x3d   : > { %671 = vmatpush1.msra.mxu1 %v438_v46  ;;  %595 = vmatprep.subr.mxu0 %v274_v47  ;;  %v569_v4 = vld [vmem:[#allocation5 + $0x9e0] sm:$0xff]  ;;  %v404_v7 = vld [vmem:[#allocation5 + $0x4b8] sm:$0xff]  ;;  %v563_v10 = vld [vmem:[#allocation5 + $0x9b0] sm:$0xff] }
  0x3e   : > { %672 = vmatprep.subr.mxu1 %v434_v48  ;;  %596 = vmatpush1.msra.mxu0 %v273_v49  ;;  %v564_v8 = vld [vmem:[#allocation5 + $0x9b8] sm:$0xff]  ;;  %v399_v11 = vld [vmem:[#allocation5 + $0x490] sm:$0xff]  ;;  %v398_v13 = vld [vmem:[#allocation5 + $0x488] sm:$0xff] }
  0x3f   : > { %673 = vmatpush1.msra.mxu1 %v433_v50  ;;  %597 = vmatprep.subr.mxu0 %v269_v51  ;;  %v559_v12 = vld [vmem:[#allocation5 + $0x990] sm:$0xff]  ;;  %v558_v14 = vld [vmem:[#allocation5 + $0x988] sm:$0xff]  ;;  %v393_v17 = vld [vmem:[#allocation5 + $0x460] sm:$0xff] }
  0x40   : > { %674 = vmatprep.subr.mxu1 %v429_v52  ;;  %598 = vmatpush1.msra.mxu0 %v268_v53  ;;  %v394_v15 = vld [vmem:[#allocation5 + $0x468] sm:$0xff]  ;;  %v553_v18 = vld [vmem:[#allocation5 + $0x960] sm:$0xff]  ;;  %v388_v21 = vld [vmem:[#allocation5 + $0x438] sm:$0xff] }
  0x41   : > { %675 = vmatpush1.msra.mxu1 %v428_v54  ;;  %599 = vmatprep.subr.mxu0 %v264_v55  ;;  %v554_v16 = vld [vmem:[#allocation5 + $0x968] sm:$0xff]  ;;  %v389_v19 = vld [vmem:[#allocation5 + $0x440] sm:$0xff]  ;;  %v548_v22 = vld [vmem:[#allocation5 + $0x938] sm:$0xff] }
  0x42   : > { %676 = vmatprep.subr.mxu1 %v424_v56  ;;  %600 = vmatpush1.msra.mxu0 %v263_v57  ;;  %v549_v20 = vld [vmem:[#allocation5 + $0x940] sm:$0xff]  ;;  %v384_v23 = vld [vmem:[#allocation5 + $0x418] sm:$0xff]  ;;  %v383_v25 = vld [vmem:[#allocation5 + $0x410] sm:$0xff] }
  0x43   : > { %677 = vmatpush1.msra.mxu1 %v423_v58  ;;  %601 = vmatprep.subr.mxu0 %v259_v59  ;;  %v544_v24 = vld [vmem:[#allocation5 + $0x918] sm:$0xff]  ;;  %v543_v26 = vld [vmem:[#allocation5 + $0x910] sm:$0xff]  ;;  %v378_v29 = vld [vmem:[#allocation5 + $0x3e8] sm:$0xff] }
  0x44   : > { %678 = vmatprep.subr.mxu1 %v419_v60  ;;  %602 = vmatpush1.msra.mxu0 %v258_v61  ;;  %v379_v27 = vld [vmem:[#allocation5 + $0x3f0] sm:$0xff]  ;;  %v538_v30 = vld [vmem:[#allocation5 + $0x8e8] sm:$0xff]  ;;  %v373_v33 = vld [vmem:[#allocation5 + $0x3c0] sm:$0xff] }
  0x45   : > { %679 = vmatpush1.msra.mxu1 %v418_v62  ;;  %603 = vmatprep.subr.mxu0 %v254_v63  ;;  %v539_v28 = vld [vmem:[#allocation5 + $0x8f0] sm:$0xff]  ;;  %v374_v31 = vld [vmem:[#allocation5 + $0x3c8] sm:$0xff]  ;;  %v533_v34 = vld [vmem:[#allocation5 + $0x8c0] sm:$0xff] }
  0x46   : > { %680 = vmatprep.subr.mxu1 %v414_v0  ;;  %604 = vmatpush1.msra.mxu0 %v253_v1  ;;  %v534_v32 = vld [vmem:[#allocation5 + $0x8c8] sm:$0xff]  ;;  %v369_v35 = vld [vmem:[#allocation5 + $0x3a0] sm:$0xff]  ;;  %v368_v37 = vld [vmem:[#allocation5 + $0x398] sm:$0xff] }
  0x47   : > { %681 = vmatpush1.msra.mxu1 %v413_v2  ;;  %605 = vmatprep.subr.mxu0 %v409_v3  ;;  %v529_v36 = vld [vmem:[#allocation5 + $0x8a0] sm:$0xff]  ;;  %v528_v38 = vld [vmem:[#allocation5 + $0x898] sm:$0xff]  ;;  %v363_v41 = vld [vmem:[#allocation5 + $0x370] sm:$0xff] }
  0x48   : > { %682 = vmatprep.subr.mxu1 %v569_v4  ;;  %606 = vmatpush2.msra.mxu0 %v408_v5  ;;  %v364_v39 = vld [vmem:[#allocation5 + $0x378] sm:$0xff]  ;;  %v523_v42 = vld [vmem:[#allocation5 + $0x870] sm:$0xff]  ;;  %v358_v45 = vld [vmem:[#allocation5 + $0x348] sm:$0xff] }
  0x49   : > { %683 = vmatpush2.msra.mxu1 %v568_v6  ;;  %607 = vmatprep.subr.mxu0 %v404_v7  ;;  %v524_v40 = vld [vmem:[#allocation5 + $0x878] sm:$0xff]  ;;  %v359_v43 = vld [vmem:[#allocation5 + $0x350] sm:$0xff]  ;;  %v518_v46 = vld [vmem:[#allocation5 + $0x848] sm:$0xff] }
  0x4a   : > { %684 = vmatprep.subr.mxu1 %v564_v8  ;;  %608 = vmatpush2.msra.mxu0 %v403_v9  ;;  %v519_v44 = vld [vmem:[#allocation5 + $0x850] sm:$0xff]  ;;  %v354_v47 = vld [vmem:[#allocation5 + $0x328] sm:$0xff]  ;;  %v353_v49 = vld [vmem:[#allocation5 + $0x320] sm:$0xff] }
  0x4b   : > { %685 = vmatpush2.msra.mxu1 %v563_v10  ;;  %609 = vmatprep.subr.mxu0 %v399_v11  ;;  %v514_v48 = vld [vmem:[#allocation5 + $0x828] sm:$0xff]  ;;  %v513_v50 = vld [vmem:[#allocation5 + $0x820] sm:$0xff]  ;;  %v348_v53 = vld [vmem:[#allocation5 + $0x2f8] sm:$0xff] }
  0x4c   : > { %686 = vmatprep.subr.mxu1 %v559_v12  ;;  %610 = vmatpush2.msra.mxu0 %v398_v13  ;;  %v349_v51 = vld [vmem:[#allocation5 + $0x300] sm:$0xff]  ;;  %v508_v54 = vld [vmem:[#allocation5 + $0x7f8] sm:$0xff]  ;;  %v343_v57 = vld [vmem:[#allocation5 + $0x2d0] sm:$0xff] }
  0x4d   : > { %687 = vmatpush2.msra.mxu1 %v558_v14  ;;  %611 = vmatprep.subr.mxu0 %v394_v15  ;;  %v509_v52 = vld [vmem:[#allocation5 + $0x800] sm:$0xff]  ;;  %v344_v55 = vld [vmem:[#allocation5 + $0x2d8] sm:$0xff]  ;;  %v503_v58 = vld [vmem:[#allocation5 + $0x7d0] sm:$0xff] }
  0x4e   : > { %688 = vmatprep.subr.mxu1 %v554_v16  ;;  %612 = vmatpush2.msra.mxu0 %v393_v17  ;;  %v504_v56 = vld [vmem:[#allocation5 + $0x7d8] sm:$0xff]  ;;  %v339_v59 = vld [vmem:[#allocation5 + $0x2b0] sm:$0xff]  ;;  %v338_v61 = vld [vmem:[#allocation5 + $0x2a8] sm:$0xff] }
  0x4f   : > { %689 = vmatpush2.msra.mxu1 %v553_v18  ;;  %613 = vmatprep.subr.mxu0 %v389_v19  ;;  %v499_v60 = vld [vmem:[#allocation5 + $0x7b0] sm:$0xff]  ;;  %v498_v62 = vld [vmem:[#allocation5 + $0x7a8] sm:$0xff]  ;;  %v333_v1 = vld [vmem:[#allocation5 + $0x280] sm:$0xff] }
  0x50   : > { %690 = vmatprep.subr.mxu1 %v549_v20  ;;  %614 = vmatpush2.msra.mxu0 %v388_v21  ;;  %v334_v63 = vld [vmem:[#allocation5 + $0x288] sm:$0xff]  ;;  %v493_v3 = vld [vmem:[#allocation5 + $0x780] sm:$0xff]  ;;  %v331_v7 = vld [vmem:[#allocation5 + $0x270] sm:$0xff] }
  0x51   : > { %691 = vmatpush2.msra.mxu1 %v548_v22  ;;  %615 = vmatprep.subr.mxu0 %v384_v23  ;;  %v494_v0 = vld [vmem:[#allocation5 + $0x788] sm:$0xff]  ;;  %v491_v8 = vld [vmem:[#allocation5 + $0x770] sm:$0xff]  ;;  %v325_v13 = vld [vmem:[#allocation5 + $0x240] sm:$0xff] }
  0x52   : > { %692 = vmatprep.subr.mxu1 %v544_v24  ;;  %616 = vmatpush2.msra.mxu0 %v383_v25  ;;  %v1409_v2 = vld [vmem:[#allocation3 + $0x1] sm:$0xff]  ;;  %v485_v14 = vld [vmem:[#allocation5 + $0x740] sm:$0xff]  ;;  %v320_v17 = vld [vmem:[#allocation5 + $0x218] sm:$0xff] }
  0x53   : > { %693 = vmatpush2.msra.mxu1 %v543_v26  ;;  %617 = vmatprep.subr.mxu0 %v379_v27  ;;  %v1411_v4 = vld [vmem:[#allocation3 + $0x3] sm:$0xff]  ;;  %v321_v15 = vld [vmem:[#allocation5 + $0x220] sm:$0xff]  ;;  %v480_v18 = vld [vmem:[#allocation5 + $0x718] sm:$0xff] }
  0x54   : > { %694 = vmatprep.subr.mxu1 %v539_v28  ;;  %618 = vmatpush2.msra.mxu0 %v378_v29  ;;  %v1413_v5 = vld [vmem:[#allocation3] sm:$0xff]  ;;  %v481_v16 = vld [vmem:[#allocation5 + $0x720] sm:$0xff]  ;;  %v316_v19 = vld [vmem:[#allocation5 + $0x1f8] sm:$0xff] }
  0x55   : > { %695 = vmatpush2.msra.mxu1 %v538_v30  ;;  %619 = vmatprep.subr.mxu0 %v374_v31  ;;  %v1415_v6 = vld [vmem:[#allocation3 + $0x2] sm:$0xff]  ;;  %v476_v20 = vld [vmem:[#allocation5 + $0x6f8] sm:$0xff]  ;;  %v305_v29 = vld [vmem:[#allocation5 + $0x1a0] sm:$0xff] }
  0x56   : > { %696 = vmatprep.subr.mxu1 %v534_v32  ;;  %620 = vmatpush2.msra.mxu0 %v373_v33  ;;  %v330_v9 = vld [vmem:[#allocation5 + $0x268] sm:$0xff]  ;;  %v315_v21 = vld [vmem:[#allocation5 + $0x1f0] sm:$0xff]  ;;  %v465_v30 = vld [vmem:[#allocation5 + $0x6a0] sm:$0xff] }
  0x57   : > { %697 = vmatpush2.msra.mxu1 %v533_v34  ;;  %621 = vmatprep.subr.mxu0 %v369_v35  ;;  %v490_v10 = vld [vmem:[#allocation5 + $0x768] sm:$0xff]  ;;  %v475_v22 = vld [vmem:[#allocation5 + $0x6f0] sm:$0xff]  ;;  %v301_v31 = vld [vmem:[#allocation5 + $0x180] sm:$0xff] }
  0x58   : > { %698 = vmatprep.subr.mxu1 %v529_v36  ;;  %622 = vmatpush2.msra.mxu0 %v368_v37  ;;  %v326_v11 = vld [vmem:[#allocation5 + $0x248] sm:$0xff]  ;;  %v311_v23 = vld [vmem:[#allocation5 + $0x1d0] sm:$0xff]  ;;  %v461_v32 = vld [vmem:[#allocation5 + $0x680] sm:$0xff] }
  0x59   : > { %699 = vmatpush2.msra.mxu1 %v528_v38  ;;  %623 = vmatprep.subr.mxu0 %v364_v39  ;;  %v486_v12 = vld [vmem:[#allocation5 + $0x748] sm:$0xff]  ;;  %v471_v24 = vld [vmem:[#allocation5 + $0x6d0] sm:$0xff]  ;;  %v300_v33 = vld [vmem:[#allocation5 + $0x178] sm:$0xff] }
  0x5a   : > { %700 = vmatprep.subr.mxu1 %v524_v40  ;;  %624 = vmatpush2.msra.mxu0 %v363_v41  ;;  %v310_v25 = vld [vmem:[#allocation5 + $0x1c8] sm:$0xff]  ;;  %v460_v34 = vld [vmem:[#allocation5 + $0x678] sm:$0xff]  ;;  %v295_v37 = vld [vmem:[#allocation5 + $0x150] sm:$0xff] }
  0x5b   : > { %701 = vmatpush2.msra.mxu1 %v523_v42  ;;  %625 = vmatprep.subr.mxu0 %v359_v43  ;;  %v470_v26 = vld [vmem:[#allocation5 + $0x6c8] sm:$0xff]  ;;  %v296_v35 = vld [vmem:[#allocation5 + $0x158] sm:$0xff]  ;;  %v455_v38 = vld [vmem:[#allocation5 + $0x650] sm:$0xff] }
  0x5c   : > { %702 = vmatprep.subr.mxu1 %v519_v44  ;;  %626 = vmatpush2.msra.mxu0 %v358_v45  ;;  %v306_v27 = vld [vmem:[#allocation5 + $0x1a8] sm:$0xff]  ;;  %v456_v36 = vld [vmem:[#allocation5 + $0x658] sm:$0xff]  ;;  %v291_v39 = vld [vmem:[#allocation5 + $0x130] sm:$0xff] }
  0x5d   : > { %703 = vmatpush2.msra.mxu1 %v518_v46  ;;  %627 = vmatprep.subr.mxu0 %v354_v47  ;;  %v466_v28 = vld [vmem:[#allocation5 + $0x6a8] sm:$0xff]  ;;  %v451_v40 = vld [vmem:[#allocation5 + $0x630] sm:$0xff]  ;;  %v285_v45 = vld [vmem:[#allocation5 + $0x100] sm:$0xff] }
  0x5e   : > { %704 = vmatprep.subr.mxu1 %v514_v48  ;;  %628 = vmatpush2.msra.mxu0 %v353_v49  ;;  %v290_v41 = vld [vmem:[#allocation5 + $0x128] sm:$0xff]  ;;  %v445_v46 = vld [vmem:[#allocation5 + $0x600] sm:$0xff]  ;;  %v280_v49 = vld [vmem:[#allocation5 + $0xd8] sm:$0xff] }
  0x5f   : > { %705 = vmatpush2.msra.mxu1 %v513_v50  ;;  %629 = vmatprep.subr.mxu0 %v349_v51  ;;  %v450_v42 = vld [vmem:[#allocation5 + $0x628] sm:$0xff]  ;;  %v281_v47 = vld [vmem:[#allocation5 + $0xe0] sm:$0xff]  ;;  %v440_v50 = vld [vmem:[#allocation5 + $0x5d8] sm:$0xff] }
  0x60   : > { %706 = vmatprep.subr.mxu1 %v509_v52  ;;  %630 = vmatpush2.msra.mxu0 %v348_v53  ;;  %v286_v43 = vld [vmem:[#allocation5 + $0x108] sm:$0xff]  ;;  %v441_v48 = vld [vmem:[#allocation5 + $0x5e0] sm:$0xff]  ;;  %v276_v51 = vld [vmem:[#allocation5 + $0xb8] sm:$0xff] }
  0x61   : > { %707 = vmatpush2.msra.mxu1 %v508_v54  ;;  %631 = vmatprep.subr.mxu0 %v344_v55  ;;  %v446_v44 = vld [vmem:[#allocation5 + $0x608] sm:$0xff]  ;;  %v436_v52 = vld [vmem:[#allocation5 + $0x5b8] sm:$0xff]  ;;  %v275_v53 = vld [vmem:[#allocation5 + $0xb0] sm:$0xff] }
  0x62   : > { %708 = vmatprep.subr.mxu1 %v504_v56  ;;  %632 = vmatpush2.msra.mxu0 %v343_v57  ;;  %v435_v54 = vld [vmem:[#allocation5 + $0x5b0] sm:$0xff]  ;;  %v270_v57 = vld [vmem:[#allocation5 + $0x88] sm:$0xff] }
  0x63   : > { %709 = vmatpush2.msra.mxu1 %v503_v58  ;;  %633 = vmatprep.subr.mxu0 %v339_v59  ;;  %v271_v55 = vld [vmem:[#allocation5 + $0x90] sm:$0xff]  ;;  %v430_v58 = vld [vmem:[#allocation5 + $0x588] sm:$0xff] }
  0x64   : > { %710 = vmatprep.subr.mxu1 %v499_v60  ;;  %634 = vmatpush2.msra.mxu0 %v338_v61  ;;  %v431_v56 = vld [vmem:[#allocation5 + $0x590] sm:$0xff]  ;;  %v266_v59 = vld [vmem:[#allocation5 + $0x68] sm:$0xff]  ;;  %v265_v61 = vld [vmem:[#allocation5 + $0x60] sm:$0xff] }
  0x65   : > { %711 = vmatpush2.msra.mxu1 %v498_v62  ;;  %635 = vmatprep.subr.mxu0 %v334_v63  ;;  %v426_v60 = vld [vmem:[#allocation5 + $0x568] sm:$0xff]  ;;  %v425_v62 = vld [vmem:[#allocation5 + $0x560] sm:$0xff] }
  0x66   : > { %712 = vmatprep.subr.mxu1 %v494_v0  ;;  %636 = vmatpush2.msra.mxu0 %v333_v1  ;;  %v261_v63 = vld [vmem:[#allocation5 + $0x40] sm:$0xff]  ;;  %v260_v1 = vld [vmem:[#allocation5 + $0x38] sm:$0xff] }
  0x67   : > { %637 = vmatprep.mubr.f32.mxu0 %v1409_v2  ;;  %713 = vmatpush2.msra.mxu1 %v493_v3  ;;  %v421_v0 = vld [vmem:[#allocation5 + $0x540] sm:$0xff]  ;;  %v420_v3 = vld [vmem:[#allocation5 + $0x538] sm:$0xff] }
  0x68   : > { %714 = vmatprep.mubr.f32.mxu1 %v1411_v4  ;;  %638 = vmatmul.mubr.f32.vlgmr.msra.gmra.mxu0 %v1413_v5 }
  0x69   : > { %715 = vmatmul.mubr.f32.vlgmr.msra.gmra.mxu1 %v1415_v6  ;;  %727 = vmatprep.subr.mxu0 %v331_v7  ;;  %v256_v7 = vld [vmem:[#allocation5 + $0x18] sm:$0xff] }
  0x6a   : > { %804 = vmatprep.subr.mxu1 %v491_v8  ;;  %728 = vmatpush1.msra.mxu0 %v330_v9  ;;  %v416_v8 = vld [vmem:[#allocation5 + $0x518] sm:$0xff]  ;;  %v255_v9 = vld [vmem:[#allocation5 + $0x10] sm:$0xff] }
  0x6b   : > { %805 = vmatpush1.msra.mxu1 %v490_v10  ;;  %729 = vmatprep.subr.mxu0 %v326_v11  ;;  %v415_v10 = vld [vmem:[#allocation5 + $0x510] sm:$0xff] }
  0x6c   : > { %806 = vmatprep.subr.mxu1 %v486_v12  ;;  %730 = vmatpush1.msra.mxu0 %v325_v13  ;;  %v411_v11 = vld [vmem:[#allocation5 + $0x4f0] sm:$0xff]  ;;  %v410_v13 = vld [vmem:[#allocation5 + $0x4e8] sm:$0xff] }
  0x6d   : > { %807 = vmatpush1.msra.mxu1 %v485_v14  ;;  %731 = vmatprep.subr.mxu0 %v321_v15  ;;  %v571_v12 = vld [vmem:[#allocation5 + $0x9f0] sm:$0xff]  ;;  %v570_v14 = vld [vmem:[#allocation5 + $0x9e8] sm:$0xff] }
  0x6e   : > { %808 = vmatprep.subr.mxu1 %v481_v16  ;;  %732 = vmatpush1.msra.mxu0 %v320_v17  ;;  %v406_v15 = vld [vmem:[#allocation5 + $0x4c8] sm:$0xff]  ;;  %v405_v17 = vld [vmem:[#allocation5 + $0x4c0] sm:$0xff] }
  0x6f   : > { %809 = vmatpush1.msra.mxu1 %v480_v18  ;;  %733 = vmatprep.subr.mxu0 %v316_v19  ;;  %v566_v16 = vld [vmem:[#allocation5 + $0x9c8] sm:$0xff]  ;;  %v565_v18 = vld [vmem:[#allocation5 + $0x9c0] sm:$0xff] }
  0x70   : > { %810 = vmatprep.subr.mxu1 %v476_v20  ;;  %734 = vmatpush1.msra.mxu0 %v315_v21  ;;  %v401_v19 = vld [vmem:[#allocation5 + $0x4a0] sm:$0xff]  ;;  %v400_v21 = vld [vmem:[#allocation5 + $0x498] sm:$0xff] }
  0x71   : > { %811 = vmatpush1.msra.mxu1 %v475_v22  ;;  %735 = vmatprep.subr.mxu0 %v311_v23  ;;  %v561_v20 = vld [vmem:[#allocation5 + $0x9a0] sm:$0xff]  ;;  %v560_v22 = vld [vmem:[#allocation5 + $0x998] sm:$0xff] }
  0x72   : > { %812 = vmatprep.subr.mxu1 %v471_v24  ;;  %736 = vmatpush1.msra.mxu0 %v310_v25  ;;  %v396_v23 = vld [vmem:[#allocation5 + $0x478] sm:$0xff]  ;;  %v395_v25 = vld [vmem:[#allocation5 + $0x470] sm:$0xff] }
  0x73   : > { %813 = vmatpush1.msra.mxu1 %v470_v26  ;;  %737 = vmatprep.subr.mxu0 %v306_v27  ;;  %v556_v24 = vld [vmem:[#allocation5 + $0x978] sm:$0xff]  ;;  %v555_v26 = vld [vmem:[#allocation5 + $0x970] sm:$0xff] }
  0x74   : > { %814 = vmatprep.subr.mxu1 %v466_v28  ;;  %738 = vmatpush1.msra.mxu0 %v305_v29  ;;  %v391_v27 = vld [vmem:[#allocation5 + $0x450] sm:$0xff]  ;;  %v390_v29 = vld [vmem:[#allocation5 + $0x448] sm:$0xff] }
  0x75   : > { %815 = vmatpush1.msra.mxu1 %v465_v30  ;;  %739 = vmatprep.subr.mxu0 %v301_v31  ;;  %v551_v28 = vld [vmem:[#allocation5 + $0x950] sm:$0xff]  ;;  %v550_v30 = vld [vmem:[#allocation5 + $0x948] sm:$0xff] }
  0x76   : > { %816 = vmatprep.subr.mxu1 %v461_v32  ;;  %740 = vmatpush1.msra.mxu0 %v300_v33  ;;  %v386_v31 = vld [vmem:[#allocation5 + $0x428] sm:$0xff]  ;;  %v385_v33 = vld [vmem:[#allocation5 + $0x420] sm:$0xff] }
  0x77   : > { %817 = vmatpush1.msra.mxu1 %v460_v34  ;;  %741 = vmatprep.subr.mxu0 %v296_v35  ;;  %v546_v32 = vld [vmem:[#allocation5 + $0x928] sm:$0xff]  ;;  %v545_v34 = vld [vmem:[#allocation5 + $0x920] sm:$0xff] }
  0x78   : > { %818 = vmatprep.subr.mxu1 %v456_v36  ;;  %742 = vmatpush1.msra.mxu0 %v295_v37  ;;  %v381_v35 = vld [vmem:[#allocation5 + $0x400] sm:$0xff]  ;;  %v380_v37 = vld [vmem:[#allocation5 + $0x3f8] sm:$0xff] }
  0x79   : > { %819 = vmatpush1.msra.mxu1 %v455_v38  ;;  %743 = vmatprep.subr.mxu0 %v291_v39  ;;  %v541_v36 = vld [vmem:[#allocation5 + $0x900] sm:$0xff]  ;;  %v540_v38 = vld [vmem:[#allocation5 + $0x8f8] sm:$0xff] }
  0x7a   : > { %820 = vmatprep.subr.mxu1 %v451_v40  ;;  %744 = vmatpush1.msra.mxu0 %v290_v41  ;;  %v376_v39 = vld [vmem:[#allocation5 + $0x3d8] sm:$0xff]  ;;  %v375_v41 = vld [vmem:[#allocation5 + $0x3d0] sm:$0xff] }
  0x7b   : > { %821 = vmatpush1.msra.mxu1 %v450_v42  ;;  %745 = vmatprep.subr.mxu0 %v286_v43  ;;  %v536_v40 = vld [vmem:[#allocation5 + $0x8d8] sm:$0xff]  ;;  %v535_v42 = vld [vmem:[#allocation5 + $0x8d0] sm:$0xff] }
  0x7c   : > { %822 = vmatprep.subr.mxu1 %v446_v44  ;;  %746 = vmatpush1.msra.mxu0 %v285_v45  ;;  %v371_v43 = vld [vmem:[#allocation5 + $0x3b0] sm:$0xff]  ;;  %v370_v45 = vld [vmem:[#allocation5 + $0x3a8] sm:$0xff] }
  0x7d   : > { %823 = vmatpush1.msra.mxu1 %v445_v46  ;;  %747 = vmatprep.subr.mxu0 %v281_v47  ;;  %v531_v44 = vld [vmem:[#allocation5 + $0x8b0] sm:$0xff]  ;;  %v530_v46 = vld [vmem:[#allocation5 + $0x8a8] sm:$0xff] }
  0x7e   : > { %824 = vmatprep.subr.mxu1 %v441_v48  ;;  %748 = vmatpush1.msra.mxu0 %v280_v49  ;;  %v366_v47 = vld [vmem:[#allocation5 + $0x388] sm:$0xff]  ;;  %v365_v49 = vld [vmem:[#allocation5 + $0x380] sm:$0xff] }
  0x7f   : > { %825 = vmatpush1.msra.mxu1 %v440_v50  ;;  %749 = vmatprep.subr.mxu0 %v276_v51  ;;  %v526_v48 = vld [vmem:[#allocation5 + $0x888] sm:$0xff]  ;;  %v525_v50 = vld [vmem:[#allocation5 + $0x880] sm:$0xff] }
  0x80   : > { %826 = vmatprep.subr.mxu1 %v436_v52  ;;  %750 = vmatpush1.msra.mxu0 %v275_v53  ;;  %v361_v51 = vld [vmem:[#allocation5 + $0x360] sm:$0xff]  ;;  %v360_v53 = vld [vmem:[#allocation5 + $0x358] sm:$0xff] }
  0x81   : > { %827 = vmatpush1.msra.mxu1 %v435_v54  ;;  %751 = vmatprep.subr.mxu0 %v271_v55  ;;  %v521_v52 = vld [vmem:[#allocation5 + $0x860] sm:$0xff]  ;;  %v520_v54 = vld [vmem:[#allocation5 + $0x858] sm:$0xff] }
  0x82   : > { %828 = vmatprep.subr.mxu1 %v431_v56  ;;  %752 = vmatpush1.msra.mxu0 %v270_v57  ;;  %v356_v55 = vld [vmem:[#allocation5 + $0x338] sm:$0xff]  ;;  %v355_v57 = vld [vmem:[#allocation5 + $0x330] sm:$0xff] }
  0x83   : > { %829 = vmatpush1.msra.mxu1 %v430_v58  ;;  %753 = vmatprep.subr.mxu0 %v266_v59  ;;  %v516_v56 = vld [vmem:[#allocation5 + $0x838] sm:$0xff]  ;;  %v515_v58 = vld [vmem:[#allocation5 + $0x830] sm:$0xff] }
  0x84   : > { %830 = vmatprep.subr.mxu1 %v426_v60  ;;  %754 = vmatpush1.msra.mxu0 %v265_v61  ;;  %v351_v59 = vld [vmem:[#allocation5 + $0x310] sm:$0xff]  ;;  %v350_v61 = vld [vmem:[#allocation5 + $0x308] sm:$0xff] }
  0x85   : > { %831 = vmatpush1.msra.mxu1 %v425_v62  ;;  %755 = vmatprep.subr.mxu0 %v261_v63  ;;  %v511_v60 = vld [vmem:[#allocation5 + $0x810] sm:$0xff]  ;;  %v510_v62 = vld [vmem:[#allocation5 + $0x808] sm:$0xff] }
  0x86   : > { %832 = vmatprep.subr.mxu1 %v421_v0  ;;  %756 = vmatpush1.msra.mxu0 %v260_v1  ;;  %v1421_v63 = vld [vmem:[#allocation3 + $0x9] sm:$0xff]  ;;  %v346_v1 = vld [vmem:[#allocation5 + $0x2e8] sm:$0xff] }
  0x87   : > { %833 = vmatpush1.msra.mxu1 %v420_v3  ;;  %757 = vmatprep.subr.mxu0 %v256_v7  ;;  %v1423_v0 = vld [vmem:[#allocation3 + $0xb] sm:$0xff]  ;;  %v506_v3 = vld [vmem:[#allocation5 + $0x7e8] sm:$0xff] }
  0x88   : > { %834 = vmatprep.subr.mxu1 %v416_v8  ;;  %758 = vmatpush1.msra.mxu0 %v255_v9  ;;  %v1425_v7 = vld [vmem:[#allocation3 + $0x8] sm:$0xff]  ;;  %v345_v9 = vld [vmem:[#allocation5 + $0x2e0] sm:$0xff] }
  0x89   : > { %835 = vmatpush1.msra.mxu1 %v415_v10  ;;  %759 = vmatprep.subr.mxu0 %v411_v11  ;;  %v1427_v8 = vld [vmem:[#allocation3 + $0xa] sm:$0xff]  ;;  %v505_v10 = vld [vmem:[#allocation5 + $0x7e0] sm:$0xff] }
  0x8a   : > { %836 = vmatprep.subr.mxu1 %v571_v12  ;;  %760 = vmatpush2.msra.mxu0 %v410_v13  ;;  %v341_v11 = vld [vmem:[#allocation5 + $0x2c0] sm:$0xff]  ;;  %v340_v13 = vld [vmem:[#allocation5 + $0x2b8] sm:$0xff] }
  0x8b   : > { %837 = vmatpush2.msra.mxu1 %v570_v14  ;;  %761 = vmatprep.subr.mxu0 %v406_v15  ;;  %v501_v12 = vld [vmem:[#allocation5 + $0x7c0] sm:$0xff]  ;;  %v500_v14 = vld [vmem:[#allocation5 + $0x7b8] sm:$0xff] }
  0x8c   : > { %838 = vmatprep.subr.mxu1 %v566_v16  ;;  %762 = vmatpush2.msra.mxu0 %v405_v17  ;;  %v336_v15 = vld [vmem:[#allocation5 + $0x298] sm:$0xff]  ;;  %v335_v17 = vld [vmem:[#allocation5 + $0x290] sm:$0xff] }
  0x8d   : > { %839 = vmatpush2.msra.mxu1 %v565_v18  ;;  %763 = vmatprep.subr.mxu0 %v401_v19  ;;  %v496_v16 = vld [vmem:[#allocation5 + $0x798] sm:$0xff]  ;;  %v495_v18 = vld [vmem:[#allocation5 + $0x790] sm:$0xff] }
  0x8e   : > { %840 = vmatprep.subr.mxu1 %v561_v20  ;;  %764 = vmatpush2.msra.mxu0 %v400_v21  ;;  %v412_v19 = vld [vmem:[#allocation5 + $0x4f8] sm:$0xff] }
  0x8f   : > { %841 = vmatpush2.msra.mxu1 %v560_v22  ;;  %765 = vmatprep.subr.mxu0 %v396_v23  ;;  %v572_v20 = vld [vmem:[#allocation5 + $0x9f8] sm:$0xff]  ;;  %v407_v23 = vld [vmem:[#allocation5 + $0x4d0] sm:$0xff] }
  0x90   : > { %842 = vmatprep.subr.mxu1 %v556_v24  ;;  %766 = vmatpush2.msra.mxu0 %v395_v25  ;;  %v332_v21 = vld [vmem:[#allocation5 + $0x278] sm:$0xff]  ;;  %v567_v24 = vld [vmem:[#allocation5 + $0x9d0] sm:$0xff] }
  0x91   : > { %843 = vmatpush2.msra.mxu1 %v555_v26  ;;  %767 = vmatprep.subr.mxu0 %v391_v27  ;;  %v492_v22 = vld [vmem:[#allocation5 + $0x778] sm:$0xff]  ;;  %v327_v25 = vld [vmem:[#allocation5 + $0x250] sm:$0xff]  ;;  %v402_v27 = vld [vmem:[#allocation5 + $0x4a8] sm:$0xff] }
  0x92   : > { %844 = vmatprep.subr.mxu1 %v551_v28  ;;  %768 = vmatpush2.msra.mxu0 %v390_v29  ;;  %v487_v26 = vld [vmem:[#allocation5 + $0x750] sm:$0xff]  ;;  %v562_v28 = vld [vmem:[#allocation5 + $0x9a8] sm:$0xff] }
  0x93   : > { %845 = vmatpush2.msra.mxu1 %v550_v30  ;;  %769 = vmatprep.subr.mxu0 %v386_v31  ;;  %v322_v29 = vld [vmem:[#allocation5 + $0x228] sm:$0xff]  ;;  %v397_v31 = vld [vmem:[#allocation5 + $0x480] sm:$0xff] }
  0x94   : > { %846 = vmatprep.subr.mxu1 %v546_v32  ;;  %770 = vmatpush2.msra.mxu0 %v385_v33  ;;  %v482_v30 = vld [vmem:[#allocation5 + $0x728] sm:$0xff]  ;;  %v557_v32 = vld [vmem:[#allocation5 + $0x980] sm:$0xff] }
  0x95   : > { %847 = vmatpush2.msra.mxu1 %v545_v34  ;;  %771 = vmatprep.subr.mxu0 %v381_v35  ;;  %v317_v33 = vld [vmem:[#allocation5 + $0x200] sm:$0xff]  ;;  %v392_v35 = vld [vmem:[#allocation5 + $0x458] sm:$0xff] }
  0x96   : > { %848 = vmatprep.subr.mxu1 %v541_v36  ;;  %772 = vmatpush2.msra.mxu0 %v380_v37  ;;  %v477_v34 = vld [vmem:[#allocation5 + $0x700] sm:$0xff]  ;;  %v552_v36 = vld [vmem:[#allocation5 + $0x958] sm:$0xff] }
  0x97   : > { %849 = vmatpush2.msra.mxu1 %v540_v38  ;;  %773 = vmatprep.subr.mxu0 %v376_v39  ;;  %v312_v37 = vld [vmem:[#allocation5 + $0x1d8] sm:$0xff]  ;;  %v387_v39 = vld [vmem:[#allocation5 + $0x430] sm:$0xff] }
  0x98   : > { %850 = vmatprep.subr.mxu1 %v536_v40  ;;  %774 = vmatpush2.msra.mxu0 %v375_v41  ;;  %v472_v38 = vld [vmem:[#allocation5 + $0x6d8] sm:$0xff]  ;;  %v547_v40 = vld [vmem:[#allocation5 + $0x930] sm:$0xff] }
  0x99   : > { %851 = vmatpush2.msra.mxu1 %v535_v42  ;;  %775 = vmatprep.subr.mxu0 %v371_v43  ;;  %v307_v41 = vld [vmem:[#allocation5 + $0x1b0] sm:$0xff]  ;;  %v382_v43 = vld [vmem:[#allocation5 + $0x408] sm:$0xff] }
  0x9a   : > { %852 = vmatprep.subr.mxu1 %v531_v44  ;;  %776 = vmatpush2.msra.mxu0 %v370_v45  ;;  %v467_v42 = vld [vmem:[#allocation5 + $0x6b0] sm:$0xff]  ;;  %v542_v44 = vld [vmem:[#allocation5 + $0x908] sm:$0xff] }
  0x9b   : > { %853 = vmatpush2.msra.mxu1 %v530_v46  ;;  %777 = vmatprep.subr.mxu0 %v366_v47  ;;  %v302_v45 = vld [vmem:[#allocation5 + $0x188] sm:$0xff]  ;;  %v377_v47 = vld [vmem:[#allocation5 + $0x3e0] sm:$0xff] }
  0x9c   : > { %854 = vmatprep.subr.mxu1 %v526_v48  ;;  %778 = vmatpush2.msra.mxu0 %v365_v49  ;;  %v462_v46 = vld [vmem:[#allocation5 + $0x688] sm:$0xff]  ;;  %v537_v48 = vld [vmem:[#allocation5 + $0x8e0] sm:$0xff] }
  0x9d   : > { %855 = vmatpush2.msra.mxu1 %v525_v50  ;;  %779 = vmatprep.subr.mxu0 %v361_v51  ;;  %v297_v49 = vld [vmem:[#allocation5 + $0x160] sm:$0xff]  ;;  %v372_v51 = vld [vmem:[#allocation5 + $0x3b8] sm:$0xff] }
  0x9e   : > { %856 = vmatprep.subr.mxu1 %v521_v52  ;;  %780 = vmatpush2.msra.mxu0 %v360_v53  ;;  %v457_v50 = vld [vmem:[#allocation5 + $0x660] sm:$0xff]  ;;  %v532_v52 = vld [vmem:[#allocation5 + $0x8b8] sm:$0xff] }
  0x9f   : > { %857 = vmatpush2.msra.mxu1 %v520_v54  ;;  %781 = vmatprep.subr.mxu0 %v356_v55  ;;  %v292_v53 = vld [vmem:[#allocation5 + $0x138] sm:$0xff]  ;;  %v367_v55 = vld [vmem:[#allocation5 + $0x390] sm:$0xff] }
  0xa0   : > { %858 = vmatprep.subr.mxu1 %v516_v56  ;;  %782 = vmatpush2.msra.mxu0 %v355_v57  ;;  %v452_v54 = vld [vmem:[#allocation5 + $0x638] sm:$0xff]  ;;  %v527_v56 = vld [vmem:[#allocation5 + $0x890] sm:$0xff] }
  0xa1   : > { %859 = vmatpush2.msra.mxu1 %v515_v58  ;;  %783 = vmatprep.subr.mxu0 %v351_v59  ;;  %v287_v57 = vld [vmem:[#allocation5 + $0x110] sm:$0xff]  ;;  %v362_v59 = vld [vmem:[#allocation5 + $0x368] sm:$0xff] }
  0xa2   : > { %860 = vmatprep.subr.mxu1 %v511_v60  ;;  %784 = vmatpush2.msra.mxu0 %v350_v61  ;;  %v447_v58 = vld [vmem:[#allocation5 + $0x610] sm:$0xff]  ;;  %v522_v60 = vld [vmem:[#allocation5 + $0x868] sm:$0xff] }
  0xa3   : > { %861 = vmatpush2.msra.mxu1 %v510_v62  ;;  %643 = vmatprep.mubr.f32.mxu0 %v1421_v63  ;;  %v282_v61 = vld [vmem:[#allocation5 + $0xe8] sm:$0xff] }
  0xa4   : > { %720 = vmatprep.mubr.f32.mxu1 %v1423_v0  ;;  %785 = vmatprep.subr.mxu0 %v346_v1  ;;  %v442_v62 = vld [vmem:[#allocation5 + $0x5e8] sm:$0xff]  ;;  %v357_v1 = vld [vmem:[#allocation5 + $0x340] sm:$0xff] }
  0xa5   : > { %862 = vmatprep.subr.mxu1 %v506_v3  ;;  %644 = vmatmul.mubr.f32.gmra.mxu0 %v1425_v7  ;;  %v517_v3 = vld [vmem:[#allocation5 + $0x840] sm:$0xff] }
  0xa6   : > { %721 = vmatmul.mubr.f32.gmra.mxu1 %v1427_v8  ;;  %786 = vmatpush2.msra.mxu0 %v345_v9  ;;  %v277_v9 = vld [vmem:[#allocation5 + $0xc0] sm:$0xff] }
  0xa7   : > { %863 = vmatpush2.msra.mxu1 %v505_v10  ;;  %787 = vmatprep.subr.mxu0 %v341_v11  ;;  %v437_v10 = vld [vmem:[#allocation5 + $0x5c0] sm:$0xff]  ;;  %v352_v11 = vld [vmem:[#allocation5 + $0x318] sm:$0xff] }
  0xa8   : > { %864 = vmatprep.subr.mxu1 %v501_v12  ;;  %788 = vmatpush2.msra.mxu0 %v340_v13  ;;  %v512_v12 = vld [vmem:[#allocation5 + $0x818] sm:$0xff] }
  0xa9   : > { %865 = vmatpush2.msra.mxu1 %v500_v14  ;;  %789 = vmatprep.subr.mxu0 %v336_v15  ;;  %v272_v13 = vld [vmem:[#allocation5 + $0x98] sm:$0xff]  ;;  %v347_v15 = vld [vmem:[#allocation5 + $0x2f0] sm:$0xff] }
  0xaa   : > { %866 = vmatprep.subr.mxu1 %v496_v16  ;;  %790 = vmatpush2.msra.mxu0 %v335_v17  ;;  %v432_v14 = vld [vmem:[#allocation5 + $0x598] sm:$0xff]  ;;  %v507_v16 = vld [vmem:[#allocation5 + $0x7f0] sm:$0xff] }
  0xab   : > { %791 = vmatprep.mubr.f32.mxu0 %v1409_v2  ;;  %867 = vmatpush2.msra.mxu1 %v495_v18  ;;  %v267_v17 = vld [vmem:[#allocation5 + $0x70] sm:$0xff] }
  0xac   : > { %868 = vmatprep.mubr.f32.mxu1 %v1411_v4  ;;  %792 = vmatmul.mubr.f32.vlgmr.msra.gmra.mxu0 %v1413_v5  ;;  %v427_v18 = vld [vmem:[#allocation5 + $0x570] sm:$0xff] }
  0xad   : > { %869 = vmatmul.mubr.f32.vlgmr.msra.gmra.mxu1 %v1415_v6  ;;  %1169 = vmatprep.subr.mxu0 %v412_v19  ;;  %v342_v19 = vld [vmem:[#allocation5 + $0x2c8] sm:$0xff] }
  0xae   : > { %1207 = vmatprep.subr.mxu1 %v572_v20  ;;  %1170 = vmatpush3.msra.mxu0 %v332_v21  ;;  %v502_v20 = vld [vmem:[#allocation5 + $0x7c8] sm:$0xff] }
  0xaf   : > { %1208 = vmatpush3.msra.mxu1 %v492_v22  ;;  %1171 = vmatprep.subr.mxu0 %v407_v23  ;;  %v262_v21 = vld [vmem:[#allocation5 + $0x48] sm:$0xff]  ;;  %v337_v23 = vld [vmem:[#allocation5 + $0x2a0] sm:$0xff] }
  0xb0   : > { %1209 = vmatprep.subr.mxu1 %v567_v24  ;;  %1172 = vmatpush3.msra.mxu0 %v327_v25  ;;  %v422_v22 = vld [vmem:[#allocation5 + $0x548] sm:$0xff]  ;;  %v497_v24 = vld [vmem:[#allocation5 + $0x7a0] sm:$0xff] }
  0xb1   : > { %1210 = vmatpush3.msra.mxu1 %v487_v26  ;;  %1173 = vmatprep.subr.mxu0 %v402_v27  ;;  %v257_v25 = vld [vmem:[#allocation5 + $0x20] sm:$0xff] }
  0xb2   : > { %1211 = vmatprep.subr.mxu1 %v562_v28  ;;  %1174 = vmatpush3.msra.mxu0 %v322_v29  ;;  %v417_v26 = vld [vmem:[#allocation5 + $0x520] sm:$0xff] }
  0xb3   : > { %1212 = vmatpush3.msra.mxu1 %v482_v30  ;;  %1175 = vmatprep.subr.mxu0 %v397_v31 }
  0xb4   : > { %1213 = vmatprep.subr.mxu1 %v557_v32  ;;  %1176 = vmatpush3.msra.mxu0 %v317_v33 }
  0xb5   : > { %1214 = vmatpush3.msra.mxu1 %v477_v34  ;;  %1177 = vmatprep.subr.mxu0 %v392_v35 }
  0xb6   : > { %1215 = vmatprep.subr.mxu1 %v552_v36  ;;  %1178 = vmatpush3.msra.mxu0 %v312_v37 }
  0xb7   : > { %1216 = vmatpush3.msra.mxu1 %v472_v38  ;;  %1179 = vmatprep.subr.mxu0 %v387_v39 }
  0xb8   : > { %1217 = vmatprep.subr.mxu1 %v547_v40  ;;  %1180 = vmatpush3.msra.mxu0 %v307_v41 }
  0xb9   : > { %1218 = vmatpush3.msra.mxu1 %v467_v42  ;;  %1181 = vmatprep.subr.mxu0 %v382_v43 }
  0xba   : > { %1219 = vmatprep.subr.mxu1 %v542_v44  ;;  %1182 = vmatpush3.msra.mxu0 %v302_v45 }
  0xbb   : > { %1220 = vmatpush3.msra.mxu1 %v462_v46  ;;  %1183 = vmatprep.subr.mxu0 %v377_v47 }
  0xbc   : > { %1221 = vmatprep.subr.mxu1 %v537_v48  ;;  %1184 = vmatpush3.msra.mxu0 %v297_v49 }
  0xbd   : > { %1222 = vmatpush3.msra.mxu1 %v457_v50  ;;  %1185 = vmatprep.subr.mxu0 %v372_v51 }
  0xbe   : > { %1223 = vmatprep.subr.mxu1 %v532_v52  ;;  %1186 = vmatpush3.msra.mxu0 %v292_v53 }
  0xbf   : > { %1224 = vmatpush3.msra.mxu1 %v452_v54  ;;  %1187 = vmatprep.subr.mxu0 %v367_v55 }
  0xc0   : > { %1225 = vmatprep.subr.mxu1 %v527_v56  ;;  %1188 = vmatpush3.msra.mxu0 %v287_v57 }
  0xc1   : > { %1226 = vmatpush3.msra.mxu1 %v447_v58  ;;  %1189 = vmatprep.subr.mxu0 %v362_v59 }
  0xc2   : > { %1227 = vmatprep.subr.mxu1 %v522_v60  ;;  %1190 = vmatpush3.msra.mxu0 %v282_v61 }
  0xc3   : > { %1228 = vmatpush3.msra.mxu1 %v442_v62  ;;  %1191 = vmatprep.subr.mxu0 %v357_v1 }
  0xc4   : > { %1229 = vmatprep.subr.mxu1 %v517_v3  ;;  %1192 = vmatpush3.msra.mxu0 %v277_v9 }
  0xc5   : > { %1230 = vmatpush3.msra.mxu1 %v437_v10  ;;  %1193 = vmatprep.subr.mxu0 %v352_v11 }
  0xc6   : > { %1231 = vmatprep.subr.mxu1 %v512_v12  ;;  %797 = vmatprep.mubr.f32.mxu0 %v1421_v63 }
  0xc7   : > { %874 = vmatprep.mubr.f32.mxu1 %v1423_v0  ;;  %1194 = vmatpush3.msra.mxu0 %v272_v13 }
  0xc8   : > { %1232 = vmatpush3.msra.mxu1 %v432_v14  ;;  %798 = vmatmul.mubr.f32.gmra.mxu0 %v1425_v7 }
  0xc9   : > { %875 = vmatmul.mubr.f32.gmra.mxu1 %v1427_v8  ;;  %1195 = vmatprep.subr.mxu0 %v347_v15 }
  0xca   : > { %1233 = vmatprep.subr.mxu1 %v507_v16  ;;  %1196 = vmatpush3.msra.mxu0 %v267_v17 }
  0xcb   : > { %1234 = vmatpush3.msra.mxu1 %v427_v18  ;;  %1197 = vmatprep.subr.mxu0 %v342_v19 }
  0xcc   : > { %1235 = vmatprep.subr.mxu1 %v502_v20  ;;  %1198 = vmatpush3.msra.mxu0 %v262_v21 }
  0xcd   : > { %1236 = vmatpush3.msra.mxu1 %v422_v22  ;;  %1199 = vmatprep.subr.mxu0 %v337_v23 }
  0xce   : > { %1237 = vmatprep.subr.mxu1 %v497_v24  ;;  %1200 = vmatpush3.msra.mxu0 %v257_v25 }
  0xcf   : > { %945 = vmatprep.mubr.f32.mxu0 %v1409_v2  ;;  %1238 = vmatpush3.msra.mxu1 %v417_v26 }
  0xd0   : > { %1020 = vmatprep.mubr.f32.mxu1 %v1411_v4  ;;  %946 = vmatmul.mubr.f32.vlgmr.msra.gmra.mxu0 %v1413_v5 }
  0xd1   : > { %1021 = vmatmul.mubr.f32.vlgmr.msra.gmra.mxu1 %v1415_v6  ;;  %950 = vmatprep.mubr.f32.mxu0 %v1421_v63 }
  0xd2   : > { %1025 = vmatprep.mubr.f32.mxu1 %v1423_v0 }
  0xd4   : > { %951 = vmatmul.mubr.f32.gmra.mxu0 %v1425_v7 }
  0xd5   : > { %1026 = vmatmul.mubr.f32.gmra.mxu1 %v1427_v8 }
 0x128   : > { %v639_v27 = vpop.f32.mrf.mxu0 }
 0x129   : > { %v716_v2 = vpop.f32.mrf.mxu1 }
 0x12a   : > { %v717_v28 = vadd.f32 %v716_v2, %v639_v27  ;;  %v641_v29 = vpop.f32.mrf.mxu0 }
 0x12b   : > { %v718_v30 = vpop.f32.mrf.mxu1 }
 0x12c   : > { %1031 = vst [vmem:[%s1407_s3] sm:$0xff] %v717_v28  ;;  %v719_v4 = vadd.f32 %v718_v30, %v641_v29 }
 0x12e   : > { %1032 = vst [vmem:[%s1407_s3 + $0x8] sm:$0xff] %v719_v4 }
 0x165   : > { %v645_v5 = vpop.f32.mrf.mxu0 }
 0x166   : > { %v722_v6 = vpop.f32.mrf.mxu1 }
 0x167   : > { %v723_v63 = vadd.f32 %v722_v6, %v645_v5  ;;  %v647_v0 = vpop.f32.mrf.mxu0 }
 0x168   : > { %v724_v31 = vpop.f32.mrf.mxu1 }
 0x169   : > { %1036 = vst [vmem:[%s1407_s3 + $0x28] sm:$0xff] %v723_v63  ;;  %v725_v7 = vadd.f32 %v724_v31, %v647_v0 }
 0x16b   : > { %1037 = vst [vmem:[%s1407_s3 + $0x30] sm:$0xff] %v725_v7 }
 0x16c   : > { %v793_v8 = vpop.f32.mrf.mxu0 }
 0x16d   : > { %v870_v32 = vpop.f32.mrf.mxu1 }
 0x16e   : > { %v871_v33 = vadd.f32 %v870_v32, %v793_v8  ;;  %v795_v34 = vpop.f32.mrf.mxu0 }
 0x16f   : > { %v872_v35 = vpop.f32.mrf.mxu1 }
 0x170   : > { %1033 = vst [vmem:[%s1407_s3 + $0x10] sm:$0xff] %v871_v33  ;;  %v873_v36 = vadd.f32 %v872_v35, %v795_v34 }
 0x172   : > { %1034 = vst [vmem:[%s1407_s3 + $0x18] sm:$0xff] %v873_v36 }
 0x188   : > { %v799_v37 = vpop.f32.mrf.mxu0 }
 0x189   : > { %v876_v38 = vpop.f32.mrf.mxu1 }
 0x18a   : > { %v877_v39 = vadd.f32 %v876_v38, %v799_v37  ;;  %v801_v40 = vpop.f32.mrf.mxu0 }
 0x18b   : > { %v878_v41 = vpop.f32.mrf.mxu1 }
 0x18c   : > { %1038 = vst [vmem:[%s1407_s3 + $0x38] sm:$0xff] %v877_v39  ;;  %v879_v42 = vadd.f32 %v878_v41, %v801_v40 }
 0x18e   : > { %1039 = vst [vmem:[%s1407_s3 + $0x40] sm:$0xff] %v879_v42 }
 0x190   : > { %v1201_v43 = vpop.f32.mrf.mxu0 }
 0x191   : > { %v1239_v44 = vpop.f32.mrf.mxu1 }
 0x192   : > { %v1202_v45 = vpop.f32.mrf.mxu0 }
 0x193   : > { %v1240_v46 = vpop.f32.mrf.mxu1  ;;  %v1203_v47 = vadd.f32 %v1202_v45, %v1201_v43 }
 0x194   : > { %v1241_v48 = vadd.f32 %v1240_v46, %v1239_v44  ;;  %v1204_v49 = vpop.f32.mrf.mxu0 }
 0x195   : > { %v1242_v50 = vpop.f32.mrf.mxu1 }
 0x196   : > { %v1023_v51 = vadd.f32 %v1241_v48, %v1203_v47  ;;  %v1205_v52 = vpop.f32.mrf.mxu0 }
 0x197   : > { %v1243_v53 = vpop.f32.mrf.mxu1  ;;  %v1206_v54 = vadd.f32 %v1205_v52, %v1204_v49 }
 0x198   : > { %1035 = vst [vmem:[%s1407_s3 + $0x20] sm:$0xff] %v1023_v51  ;;  %v1244_v55 = vadd.f32 %v1243_v53, %v1242_v50 }
 0x19a   : > { %v1028_v56 = vadd.f32 %v1244_v55, %v1206_v54 }
 0x19c   : > { %1040 = vst [vmem:[%s1407_s3 + $0x48] sm:$0xff] %v1028_v56 }
 0x19d PF: > { %s13_s11 = sadd.s32 1, %s1337_s11   ;;  %s1473_s9 = smov %s1333_s10 }
 0x19e   : > { %p10_p2 = scmp.ge.s32.totalorder %s13_s11, 4   ;;  %s1474_s10 = smov %s1476_s13 }
 0x1a0   :  { %12 = sbr.rel (!%p10_p2) target bundleno = 2 (0x2), region = 113 }
 0x1a5   :  { %1077 = vsyncpa [#allocation6], 1 }
 0x1a6   :  { %1079 = vsyncpa [#allocation6 + $0x1], 1 }
 0x1a7   :  { %1080 = vsyncmov [#allocation4] }
 0x1aa   :  { %s1081_s4 = vpop.sfrf %1080 }
 0x1ab   :  { %p1168_p3 = scmp.ne.s32.totalorder %s1081_s4, 0 }
 0x1ad   :  { %1085 = shalt.err (%p1168_p3)  }

</bundles_post_ra>
